<compile_context>
chip_gen: v7x
topology: tpu7x:2x2x1
jax: 0.10.0
libtpu: 0.0.40
codegen_flags: <defaults>
</compile_context>

<pallas_src>
import functools

import jax
import jax.numpy as jnp
from jax.experimental import pallas as pl
from jax.experimental.pallas import tpu as pltpu

LANE = 128


def _ensemble_kernel(mvc_ref, w_ref, b_ref, x_ref, per_ref, ens_ref):
    """Grid = (batch, pixel row-tiles); every grid step is independent.

    mvc_ref : SMEM (M,)                    per-modality ensemble weights
    w_ref   : SMEM (M*C_out*C_in,)         flat 1x1-conv weights, w[m,c,k]
    b_ref   : SMEM (M*C_out,)              flat biases, b[m,c]
    x_ref   : VMEM (1, C_in, S, 128)       dense pixel tile, channels leading
    per_ref : VMEM (M, 1, C_out, S, 128)   per-modality output tiles
    ens_ref : VMEM (1, C_out, S, 128)      ensemble output tile
    """
    C_in = x_ref.shape[1]
    M = per_ref.shape[0]
    C_out = per_ref.shape[2]

    # Load each input channel once as a dense (S, 128) tile.
    xs = [x_ref[0, k] for k in range(C_in)]

    for c in range(C_out):                       # static unroll (C_out = 3)
        ens_c = None
        for m in range(M):                       # static unroll (M = 3)
            base = (m * C_out + c) * C_in
            # y = ReLU( sum_k w[m,c,k] * x[k] + b[m,c] )   — scalar * full tile
            acc = w_ref[base] * xs[0]
            for k in range(1, C_in):
                acc = acc + w_ref[base + k] * xs[k]
            y = jnp.maximum(acc + b_ref[m * C_out + c], 0.0)

            per_ref[m, 0, c] = y                 # lane-dense (S,128) store

            contrib = mvc_ref[m] * y             # scalar * full tile
            ens_c = contrib if ens_c is None else ens_c + contrib

        ens_ref[0, c] = ens_c                    # lane-dense (S,128) store


def _pick_row_tile(num_rows, max_rows):
    """Sublane row-tile: full extent if small, else a multiple of 8 (cdiv grid)."""
    if num_rows <= max_rows:
        return num_rows, 1
    s = max(8, (max_rows // 8) * 8)
    return s, pl.cdiv(num_rows, s)


def ensemble_forward(image_nchw, weights, biases, mvc_weights, modalities,
                     *, max_row_tile=1024, seg_size=None):
    """All sub-models + weighted ensemble in one fused Pallas kernel.

    image_nchw : (B, C_in, H, W) float32
    weights    : (M, C_in, C_out) stacked 1x1-conv weights
    biases     : (M, 1, C_out)    stacked biases
    mvc_weights: (M,)             ensemble weights in [0, 1]
    Returns {modality: {"seg": (B, C_out, H, W)}, ..., "ensemble": {"seg": ...}}
    """
    del seg_size  # unused by this synthetic sub-model (kept for API parity)
    B, C_in, H, W = image_nchw.shape
    M, _, C_out = weights.shape
    HW = H * W

    # Channels-first flat pixels, padded to a lane multiple: reshape only.
    hw_pad = pl.cdiv(HW, LANE) * LANE
    x = image_nchw.reshape(B, C_in, HW)
    if hw_pad != HW:
        x = jnp.pad(x, ((0, 0), (0, 0), (0, hw_pad - HW)))
    R = hw_pad // LANE
    x = x.reshape(B, C_in, R, LANE)

    S, num_row_tiles = _pick_row_tile(R, max_row_tile)

    # Flat scalar parameters for SMEM (tiny).
    w_flat = jnp.transpose(weights, (0, 2, 1)).reshape(M * C_out * C_in)  # w[m,c,k]
    b_flat = biases.reshape(M * C_out)                                    # b[m,c]
    mvc = mvc_weights.reshape(M).astype(jnp.float32)

    per_out, ens_out = pl.pallas_call(
        _ensemble_kernel,
        out_shape=(
            jax.ShapeDtypeStruct((M, B, C_out, R, LANE), jnp.float32),
            jax.ShapeDtypeStruct((B, C_out, R, LANE), jnp.float32),
        ),
        grid=(B, num_row_tiles),
        in_specs=[
            pl.BlockSpec(memory_space=pltpu.MemorySpace.SMEM),              # mvc
            pl.BlockSpec(memory_space=pltpu.MemorySpace.SMEM),              # W
            pl.BlockSpec(memory_space=pltpu.MemorySpace.SMEM),              # b
            pl.BlockSpec((1, C_in, S, LANE), lambda b, j: (b, 0, j, 0)),    # x
        ],
        out_specs=(
            pl.BlockSpec((M, 1, C_out, S, LANE), lambda b, j: (0, b, 0, j, 0)),
            pl.BlockSpec((1, C_out, S, LANE), lambda b, j: (b, 0, j, 0)),
        ),
        compiler_params=pltpu.CompilerParams(
            dimension_semantics=("parallel", "parallel"),
            vmem_limit_bytes=40 * 1024 * 1024,   # safe on v5e/v6e/v7x
        ),
    )(mvc, w_flat, b_flat, x)

    # Channels-first outputs reshape directly back to NCHW (no transposes).
    per_flat = per_out.reshape(M, B, C_out, hw_pad)[..., :HW]
    ens_flat = ens_out.reshape(B, C_out, hw_pad)[..., :HW]
    result = {mod: {"seg": per_flat[i].reshape(B, C_out, H, W)}
              for i, mod in enumerate(modalities)}
    result["ensemble"] = {"seg": ens_flat.reshape(B, C_out, H, W)}
    return result


def _reference_forward(image_nchw, weights, biases, mvc_weights, modalities):
    """Pure-jnp reference mirroring the PyTorch EnsembleModel semantics."""
    B, C_in, H, W = image_nchw.shape
    C_out = weights.shape[-1]
    x = jnp.transpose(image_nchw, (0, 2, 3, 1)).reshape(-1, C_in)
    result = {}
    for i, mod in enumerate(modalities):
        y = jnp.maximum(x @ weights[i] + biases[i, 0], 0.0)
        result[mod] = {"seg": y}
    avg = jnp.zeros_like(result[modalities[0]]["seg"])
    for i, mod in enumerate(modalities):
        avg = avg + mvc_weights[i] * result[mod]["seg"]
    result["ensemble"] = {"seg": avg}
    return {
        k: {"seg": jnp.transpose(v["seg"].reshape(B, H, W, C_out), (0, 3, 1, 2))}
        for k, v in result.items()
    }


if __name__ == "__main__":
    key = jax.random.PRNGKey(0)
    k_img, k_w, k_b = jax.random.split(key, 3)

    # Small shapes consistent with the module's forward (NCHW image input).
    B, C_in, H, W = 2, 4, 16, 16
    C_out = 3                                  # segmentation classes
    modalities = ("t1", "t2", "flair")
    M = len(modalities)

    image = jax.random.normal(k_img, (B, C_in, H, W), dtype=jnp.float32)

    # Deterministic per-modality 1x1-conv parameters (stacked over modalities).
    weights = 0.1 * jax.random.normal(k_w, (M, C_in, C_out), dtype=jnp.float32)
    biases = 0.05 * jax.random.normal(k_b, (M, 1, C_out), dtype=jnp.float32)

    # mvc_single_weight per modality, each in [0, 1] as asserted in __init__.
    mvc = jnp.array([0.5, 0.3, 0.2], dtype=jnp.float32)
    assert bool(jnp.all((mvc >= 0.0) & (mvc <= 1.0)))

    fwd = jax.jit(functools.partial(ensemble_forward, modalities=modalities))
    out = fwd(image, weights, biases, mvc)
    jax.block_until_ready(out)

    ref = _reference_forward(image, weights, biases, mvc, modalities)
    for k in list(modalities) + ["ensemble"]:
        assert jnp.allclose(out[k]["seg"], ref[k]["seg"], atol=1e-5, rtol=1e-5), k

    print("KERNEL_OK")
</pallas_src>

<mosaic_0001>
module attributes {stable_mosaic.version = 11 : i64} {
  func.func @_ensemble_kernel(%arg0: i32, %arg1: i32, %arg2: memref<3xf32, #tpu.memory_space<smem>>, %arg3: memref<36xf32, #tpu.memory_space<smem>>, %arg4: memref<9xf32, #tpu.memory_space<smem>>, %arg5: memref<1x4x2x128xf32, #tpu.memory_space<vmem>>, %arg6: memref<3x1x3x2x128xf32, #tpu.memory_space<vmem>>, %arg7: memref<1x3x2x128xf32, #tpu.memory_space<vmem>>) attributes {dimension_semantics = [#tpu.dimension_semantics<parallel>, #tpu.dimension_semantics<parallel>], iteration_bounds = array<i64: 2, 1>, scalar_prefetch = 0 : i64, scratch_operands = 0 : i64, tpu.core_type = #tpu.core_type<tc>, window_params = [{transform_indices = @transform_0, window_bounds = array<i64: 3>}, {transform_indices = @transform_1, window_bounds = array<i64: 36>}, {transform_indices = @transform_2, window_bounds = array<i64: 9>}, {transform_indices = @transform_3, window_bounds = array<i64: 1, 4, 2, 128>}, {transform_indices = @transform_4, window_bounds = array<i64: 3, 1, 3, 2, 128>}, {transform_indices = @transform_5, window_bounds = array<i64: 1, 3, 2, 128>}]} {
    %c0 = arith.constant 0 : index
    %c0_0 = arith.constant 0 : index
    %c0_1 = arith.constant 0 : index
    %c0_2 = arith.constant 0 : index
    %0 = vector.load %arg5[%c0, %c0_0, %c0_1, %c0_2] : memref<1x4x2x128xf32, #tpu.memory_space<vmem>>, vector<1x1x2x128xf32>
    %1 = vector.shape_cast %0 : vector<1x1x2x128xf32> to vector<2x128xf32>
    %c0_3 = arith.constant 0 : index
    %c1 = arith.constant 1 : index
    %c0_4 = arith.constant 0 : index
    %c0_5 = arith.constant 0 : index
    %2 = vector.load %arg5[%c0_3, %c1, %c0_4, %c0_5] : memref<1x4x2x128xf32, #tpu.memory_space<vmem>>, vector<1x1x2x128xf32>
    %3 = vector.shape_cast %2 : vector<1x1x2x128xf32> to vector<2x128xf32>
    %c0_6 = arith.constant 0 : index
    %c2 = arith.constant 2 : index
    %c0_7 = arith.constant 0 : index
    %c0_8 = arith.constant 0 : index
    %4 = vector.load %arg5[%c0_6, %c2, %c0_7, %c0_8] : memref<1x4x2x128xf32, #tpu.memory_space<vmem>>, vector<1x1x2x128xf32>
    %5 = vector.shape_cast %4 : vector<1x1x2x128xf32> to vector<2x128xf32>
    %c0_9 = arith.constant 0 : index
    %c3 = arith.constant 3 : index
    %c0_10 = arith.constant 0 : index
    %c0_11 = arith.constant 0 : index
    %6 = vector.load %arg5[%c0_9, %c3, %c0_10, %c0_11] : memref<1x4x2x128xf32, #tpu.memory_space<vmem>>, vector<1x1x2x128xf32>
    %7 = vector.shape_cast %6 : vector<1x1x2x128xf32> to vector<2x128xf32>
    %c0_12 = arith.constant 0 : index
    %8 = memref.load %arg3[%c0_12] : memref<36xf32, #tpu.memory_space<smem>>
    %9 = vector.broadcast %8 : f32 to vector<2x128xf32>
    %10 = arith.mulf %9, %1 : vector<2x128xf32>
    %c1_13 = arith.constant 1 : index
    %11 = memref.load %arg3[%c1_13] : memref<36xf32, #tpu.memory_space<smem>>
    %12 = vector.broadcast %11 : f32 to vector<2x128xf32>
    %13 = arith.mulf %12, %3 : vector<2x128xf32>
    %14 = arith.addf %10, %13 : vector<2x128xf32>
    %c2_14 = arith.constant 2 : index
    %15 = memref.load %arg3[%c2_14] : memref<36xf32, #tpu.memory_space<smem>>
    %16 = vector.broadcast %15 : f32 to vector<2x128xf32>
    %17 = arith.mulf %16, %5 : vector<2x128xf32>
    %18 = arith.addf %14, %17 : vector<2x128xf32>
    %c3_15 = arith.constant 3 : index
    %19 = memref.load %arg3[%c3_15] : memref<36xf32, #tpu.memory_space<smem>>
    %20 = vector.broadcast %19 : f32 to vector<2x128xf32>
    %21 = arith.mulf %20, %7 : vector<2x128xf32>
    %22 = arith.addf %18, %21 : vector<2x128xf32>
    %c0_16 = arith.constant 0 : index
    %23 = memref.load %arg4[%c0_16] : memref<9xf32, #tpu.memory_space<smem>>
    %24 = vector.broadcast %23 : f32 to vector<2x128xf32>
    %25 = arith.addf %22, %24 : vector<2x128xf32>
    %cst = arith.constant 0.000000e+00 : f32
    %26 = vector.broadcast %cst : f32 to vector<2x128xf32>
    %27 = arith.maximumf %25, %26 : vector<2x128xf32>
    %c0_17 = arith.constant 0 : index
    %c0_18 = arith.constant 0 : index
    %c0_19 = arith.constant 0 : index
    %c0_20 = arith.constant 0 : index
    %c0_21 = arith.constant 0 : index
    %28 = vector.load %arg6[%c0_17, %c0_18, %c0_19, %c0_20, %c0_21] : memref<3x1x3x2x128xf32, #tpu.memory_space<vmem>>, vector<1x1x1x2x128xf32>
    %29 = vector.shape_cast %28 : vector<1x1x1x2x128xf32> to vector<2x128xf32>
    %30 = vector.shape_cast %27 : vector<2x128xf32> to vector<1x1x1x2x128xf32>
    tpu.vector_store %arg6[%c0_17, %c0_18, %c0_19, %c0_20, %c0_21], %30 {strides = array<i32>} : memref<3x1x3x2x128xf32, #tpu.memory_space<vmem>>, vector<1x1x1x2x128xf32>,
    %c0_22 = arith.constant 0 : index
    %31 = memref.load %arg2[%c0_22] : memref<3xf32, #tpu.memory_space<smem>>
    %32 = vector.broadcast %31 : f32 to vector<2x128xf32>
    %33 = arith.mulf %32, %27 : vector<2x128xf32>
    %c12 = arith.constant 12 : index
    %34 = memref.load %arg3[%c12] : memref<36xf32, #tpu.memory_space<smem>>
    %35 = vector.broadcast %34 : f32 to vector<2x128xf32>
    %36 = arith.mulf %35, %1 : vector<2x128xf32>
    %c13 = arith.constant 13 : index
    %37 = memref.load %arg3[%c13] : memref<36xf32, #tpu.memory_space<smem>>
    %38 = vector.broadcast %37 : f32 to vector<2x128xf32>
    %39 = arith.mulf %38, %3 : vector<2x128xf32>
    %40 = arith.addf %36, %39 : vector<2x128xf32>
    %c14 = arith.constant 14 : index
    %41 = memref.load %arg3[%c14] : memref<36xf32, #tpu.memory_space<smem>>
    %42 = vector.broadcast %41 : f32 to vector<2x128xf32>
    %43 = arith.mulf %42, %5 : vector<2x128xf32>
    %44 = arith.addf %40, %43 : vector<2x128xf32>
    %c15 = arith.constant 15 : index
    %45 = memref.load %arg3[%c15] : memref<36xf32, #tpu.memory_space<smem>>
    %46 = vector.broadcast %45 : f32 to vector<2x128xf32>
    %47 = arith.mulf %46, %7 : vector<2x128xf32>
    %48 = arith.addf %44, %47 : vector<2x128xf32>
    %c3_23 = arith.constant 3 : index
    %49 = memref.load %arg4[%c3_23] : memref<9xf32, #tpu.memory_space<smem>>
    %50 = vector.broadcast %49 : f32 to vector<2x128xf32>
    %51 = arith.addf %48, %50 : vector<2x128xf32>
    %cst_24 = arith.constant 0.000000e+00 : f32
    %52 = vector.broadcast %cst_24 : f32 to vector<2x128xf32>
    %53 = arith.maximumf %51, %52 : vector<2x128xf32>
    %c1_25 = arith.constant 1 : index
    %c0_26 = arith.constant 0 : index
    %c0_27 = arith.constant 0 : index
    %c0_28 = arith.constant 0 : index
    %c0_29 = arith.constant 0 : index
    %54 = vector.load %arg6[%c1_25, %c0_26, %c0_27, %c0_28, %c0_29] : memref<3x1x3x2x128xf32, #tpu.memory_space<vmem>>, vector<1x1x1x2x128xf32>
    %55 = vector.shape_cast %54 : vector<1x1x1x2x128xf32> to vector<2x128xf32>
    %56 = vector.shape_cast %53 : vector<2x128xf32> to vector<1x1x1x2x128xf32>
    tpu.vector_store %arg6[%c1_25, %c0_26, %c0_27, %c0_28, %c0_29], %56 {strides = array<i32>} : memref<3x1x3x2x128xf32, #tpu.memory_space<vmem>>, vector<1x1x1x2x128xf32>,
    %c1_30 = arith.constant 1 : index
    %57 = memref.load %arg2[%c1_30] : memref<3xf32, #tpu.memory_space<smem>>
    %58 = vector.broadcast %57 : f32 to vector<2x128xf32>
    %59 = arith.mulf %58, %53 : vector<2x128xf32>
    %60 = arith.addf %33, %59 : vector<2x128xf32>
    %c24 = arith.constant 24 : index
    %61 = memref.load %arg3[%c24] : memref<36xf32, #tpu.memory_space<smem>>
    %62 = vector.broadcast %61 : f32 to vector<2x128xf32>
    %63 = arith.mulf %62, %1 : vector<2x128xf32>
    %c25 = arith.constant 25 : index
    %64 = memref.load %arg3[%c25] : memref<36xf32, #tpu.memory_space<smem>>
    %65 = vector.broadcast %64 : f32 to vector<2x128xf32>
    %66 = arith.mulf %65, %3 : vector<2x128xf32>
    %67 = arith.addf %63, %66 : vector<2x128xf32>
    %c26 = arith.constant 26 : index
    %68 = memref.load %arg3[%c26] : memref<36xf32, #tpu.memory_space<smem>>
    %69 = vector.broadcast %68 : f32 to vector<2x128xf32>
    %70 = arith.mulf %69, %5 : vector<2x128xf32>
    %71 = arith.addf %67, %70 : vector<2x128xf32>
    %c27 = arith.constant 27 : index
    %72 = memref.load %arg3[%c27] : memref<36xf32, #tpu.memory_space<smem>>
    %73 = vector.broadcast %72 : f32 to vector<2x128xf32>
    %74 = arith.mulf %73, %7 : vector<2x128xf32>
    %75 = arith.addf %71, %74 : vector<2x128xf32>
    %c6 = arith.constant 6 : index
    %76 = memref.load %arg4[%c6] : memref<9xf32, #tpu.memory_space<smem>>
    %77 = vector.broadcast %76 : f32 to vector<2x128xf32>
    %78 = arith.addf %75, %77 : vector<2x128xf32>
    %cst_31 = arith.constant 0.000000e+00 : f32
    %79 = vector.broadcast %cst_31 : f32 to vector<2x128xf32>
    %80 = arith.maximumf %78, %79 : vector<2x128xf32>
    %c2_32 = arith.constant 2 : index
    %c0_33 = arith.constant 0 : index
    %c0_34 = arith.constant 0 : index
    %c0_35 = arith.constant 0 : index
    %c0_36 = arith.constant 0 : index
    %81 = vector.load %arg6[%c2_32, %c0_33, %c0_34, %c0_35, %c0_36] : memref<3x1x3x2x128xf32, #tpu.memory_space<vmem>>, vector<1x1x1x2x128xf32>
    %82 = vector.shape_cast %81 : vector<1x1x1x2x128xf32> to vector<2x128xf32>
    %83 = vector.shape_cast %80 : vector<2x128xf32> to vector<1x1x1x2x128xf32>
    tpu.vector_store %arg6[%c2_32, %c0_33, %c0_34, %c0_35, %c0_36], %83 {strides = array<i32>} : memref<3x1x3x2x128xf32, #tpu.memory_space<vmem>>, vector<1x1x1x2x128xf32>,
    %c2_37 = arith.constant 2 : index
    %84 = memref.load %arg2[%c2_37] : memref<3xf32, #tpu.memory_space<smem>>
    %85 = vector.broadcast %84 : f32 to vector<2x128xf32>
    %86 = arith.mulf %85, %80 : vector<2x128xf32>
    %87 = arith.addf %60, %86 : vector<2x128xf32>
    %c0_38 = arith.constant 0 : index
    %c0_39 = arith.constant 0 : index
    %c0_40 = arith.constant 0 : index
    %c0_41 = arith.constant 0 : index
    %88 = vector.load %arg7[%c0_38, %c0_39, %c0_40, %c0_41] : memref<1x3x2x128xf32, #tpu.memory_space<vmem>>, vector<1x1x2x128xf32>
    %89 = vector.shape_cast %88 : vector<1x1x2x128xf32> to vector<2x128xf32>
    %90 = vector.shape_cast %87 : vector<2x128xf32> to vector<1x1x2x128xf32>
    tpu.vector_store %arg7[%c0_38, %c0_39, %c0_40, %c0_41], %90 {strides = array<i32>} : memref<1x3x2x128xf32, #tpu.memory_space<vmem>>, vector<1x1x2x128xf32>,
    %c4 = arith.constant 4 : index
    %91 = memref.load %arg3[%c4] : memref<36xf32, #tpu.memory_space<smem>>
    %92 = vector.broadcast %91 : f32 to vector<2x128xf32>
    %93 = arith.mulf %92, %1 : vector<2x128xf32>
    %c5 = arith.constant 5 : index
    %94 = memref.load %arg3[%c5] : memref<36xf32, #tpu.memory_space<smem>>
    %95 = vector.broadcast %94 : f32 to vector<2x128xf32>
    %96 = arith.mulf %95, %3 : vector<2x128xf32>
    %97 = arith.addf %93, %96 : vector<2x128xf32>
    %c6_42 = arith.constant 6 : index
    %98 = memref.load %arg3[%c6_42] : memref<36xf32, #tpu.memory_space<smem>>
    %99 = vector.broadcast %98 : f32 to vector<2x128xf32>
    %100 = arith.mulf %99, %5 : vector<2x128xf32>
    %101 = arith.addf %97, %100 : vector<2x128xf32>
    %c7 = arith.constant 7 : index
    %102 = memref.load %arg3[%c7] : memref<36xf32, #tpu.memory_space<smem>>
    %103 = vector.broadcast %102 : f32 to vector<2x128xf32>
    %104 = arith.mulf %103, %7 : vector<2x128xf32>
    %105 = arith.addf %101, %104 : vector<2x128xf32>
    %c1_43 = arith.constant 1 : index
    %106 = memref.load %arg4[%c1_43] : memref<9xf32, #tpu.memory_space<smem>>
    %107 = vector.broadcast %106 : f32 to vector<2x128xf32>
    %108 = arith.addf %105, %107 : vector<2x128xf32>
    %cst_44 = arith.constant 0.000000e+00 : f32
    %109 = vector.broadcast %cst_44 : f32 to vector<2x128xf32>
    %110 = arith.maximumf %108, %109 : vector<2x128xf32>
    %c0_45 = arith.constant 0 : index
    %c0_46 = arith.constant 0 : index
    %c1_47 = arith.constant 1 : index
    %c0_48 = arith.constant 0 : index
    %c0_49 = arith.constant 0 : index
    %111 = vector.load %arg6[%c0_45, %c0_46, %c1_47, %c0_48, %c0_49] : memref<3x1x3x2x128xf32, #tpu.memory_space<vmem>>, vector<1x1x1x2x128xf32>
    %112 = vector.shape_cast %111 : vector<1x1x1x2x128xf32> to vector<2x128xf32>
    %113 = vector.shape_cast %110 : vector<2x128xf32> to vector<1x1x1x2x128xf32>
    tpu.vector_store %arg6[%c0_45, %c0_46, %c1_47, %c0_48, %c0_49], %113 {strides = array<i32>} : memref<3x1x3x2x128xf32, #tpu.memory_space<vmem>>, vector<1x1x1x2x128xf32>,
    %c0_50 = arith.constant 0 : index
    %114 = memref.load %arg2[%c0_50] : memref<3xf32, #tpu.memory_space<smem>>
    %115 = vector.broadcast %114 : f32 to vector<2x128xf32>
    %116 = arith.mulf %115, %110 : vector<2x128xf32>
    %c16 = arith.constant 16 : index
    %117 = memref.load %arg3[%c16] : memref<36xf32, #tpu.memory_space<smem>>
    %118 = vector.broadcast %117 : f32 to vector<2x128xf32>
    %119 = arith.mulf %118, %1 : vector<2x128xf32>
    %c17 = arith.constant 17 : index
    %120 = memref.load %arg3[%c17] : memref<36xf32, #tpu.memory_space<smem>>
    %121 = vector.broadcast %120 : f32 to vector<2x128xf32>
    %122 = arith.mulf %121, %3 : vector<2x128xf32>
    %123 = arith.addf %119, %122 : vector<2x128xf32>
    %c18 = arith.constant 18 : index
    %124 = memref.load %arg3[%c18] : memref<36xf32, #tpu.memory_space<smem>>
    %125 = vector.broadcast %124 : f32 to vector<2x128xf32>
    %126 = arith.mulf %125, %5 : vector<2x128xf32>
    %127 = arith.addf %123, %126 : vector<2x128xf32>
    %c19 = arith.constant 19 : index
    %128 = memref.load %arg3[%c19] : memref<36xf32, #tpu.memory_space<smem>>
    %129 = vector.broadcast %128 : f32 to vector<2x128xf32>
    %130 = arith.mulf %129, %7 : vector<2x128xf32>
    %131 = arith.addf %127, %130 : vector<2x128xf32>
    %c4_51 = arith.constant 4 : index
    %132 = memref.load %arg4[%c4_51] : memref<9xf32, #tpu.memory_space<smem>>
    %133 = vector.broadcast %132 : f32 to vector<2x128xf32>
    %134 = arith.addf %131, %133 : vector<2x128xf32>
    %cst_52 = arith.constant 0.000000e+00 : f32
    %135 = vector.broadcast %cst_52 : f32 to vector<2x128xf32>
    %136 = arith.maximumf %134, %135 : vector<2x128xf32>
    %c1_53 = arith.constant 1 : index
    %c0_54 = arith.constant 0 : index
    %c1_55 = arith.constant 1 : index
    %c0_56 = arith.constant 0 : index
    %c0_57 = arith.constant 0 : index
    %137 = vector.load %arg6[%c1_53, %c0_54, %c1_55, %c0_56, %c0_57] : memref<3x1x3x2x128xf32, #tpu.memory_space<vmem>>, vector<1x1x1x2x128xf32>
    %138 = vector.shape_cast %137 : vector<1x1x1x2x128xf32> to vector<2x128xf32>
    %139 = vector.shape_cast %136 : vector<2x128xf32> to vector<1x1x1x2x128xf32>
    tpu.vector_store %arg6[%c1_53, %c0_54, %c1_55, %c0_56, %c0_57], %139 {strides = array<i32>} : memref<3x1x3x2x128xf32, #tpu.memory_space<vmem>>, vector<1x1x1x2x128xf32>,
    %c1_58 = arith.constant 1 : index
    %140 = memref.load %arg2[%c1_58] : memref<3xf32, #tpu.memory_space<smem>>
    %141 = vector.broadcast %140 : f32 to vector<2x128xf32>
    %142 = arith.mulf %141, %136 : vector<2x128xf32>
    %143 = arith.addf %116, %142 : vector<2x128xf32>
    %c28 = arith.constant 28 : index
    %144 = memref.load %arg3[%c28] : memref<36xf32, #tpu.memory_space<smem>>
    %145 = vector.broadcast %144 : f32 to vector<2x128xf32>
    %146 = arith.mulf %145, %1 : vector<2x128xf32>
    %c29 = arith.constant 29 : index
    %147 = memref.load %arg3[%c29] : memref<36xf32, #tpu.memory_space<smem>>
    %148 = vector.broadcast %147 : f32 to vector<2x128xf32>
    %149 = arith.mulf %148, %3 : vector<2x128xf32>
    %150 = arith.addf %146, %149 : vector<2x128xf32>
    %c30 = arith.constant 30 : index
    %151 = memref.load %arg3[%c30] : memref<36xf32, #tpu.memory_space<smem>>
    %152 = vector.broadcast %151 : f32 to vector<2x128xf32>
    %153 = arith.mulf %152, %5 : vector<2x128xf32>
    %154 = arith.addf %150, %153 : vector<2x128xf32>
    %c31 = arith.constant 31 : index
    %155 = memref.load %arg3[%c31] : memref<36xf32, #tpu.memory_space<smem>>
    %156 = vector.broadcast %155 : f32 to vector<2x128xf32>
    %157 = arith.mulf %156, %7 : vector<2x128xf32>
    %158 = arith.addf %154, %157 : vector<2x128xf32>
    %c7_59 = arith.constant 7 : index
    %159 = memref.load %arg4[%c7_59] : memref<9xf32, #tpu.memory_space<smem>>
    %160 = vector.broadcast %159 : f32 to vector<2x128xf32>
    %161 = arith.addf %158, %160 : vector<2x128xf32>
    %cst_60 = arith.constant 0.000000e+00 : f32
    %162 = vector.broadcast %cst_60 : f32 to vector<2x128xf32>
    %163 = arith.maximumf %161, %162 : vector<2x128xf32>
    %c2_61 = arith.constant 2 : index
    %c0_62 = arith.constant 0 : index
    %c1_63 = arith.constant 1 : index
    %c0_64 = arith.constant 0 : index
    %c0_65 = arith.constant 0 : index
    %164 = vector.load %arg6[%c2_61, %c0_62, %c1_63, %c0_64, %c0_65] : memref<3x1x3x2x128xf32, #tpu.memory_space<vmem>>, vector<1x1x1x2x128xf32>
    %165 = vector.shape_cast %164 : vector<1x1x1x2x128xf32> to vector<2x128xf32>
    %166 = vector.shape_cast %163 : vector<2x128xf32> to vector<1x1x1x2x128xf32>
    tpu.vector_store %arg6[%c2_61, %c0_62, %c1_63, %c0_64, %c0_65], %166 {strides = array<i32>} : memref<3x1x3x2x128xf32, #tpu.memory_space<vmem>>, vector<1x1x1x2x128xf32>,
    %c2_66 = arith.constant 2 : index
    %167 = memref.load %arg2[%c2_66] : memref<3xf32, #tpu.memory_space<smem>>
    %168 = vector.broadcast %167 : f32 to vector<2x128xf32>
    %169 = arith.mulf %168, %163 : vector<2x128xf32>
    %170 = arith.addf %143, %169 : vector<2x128xf32>
    %c0_67 = arith.constant 0 : index
    %c1_68 = arith.constant 1 : index
    %c0_69 = arith.constant 0 : index
    %c0_70 = arith.constant 0 : index
    %171 = vector.load %arg7[%c0_67, %c1_68, %c0_69, %c0_70] : memref<1x3x2x128xf32, #tpu.memory_space<vmem>>, vector<1x1x2x128xf32>
    %172 = vector.shape_cast %171 : vector<1x1x2x128xf32> to vector<2x128xf32>
    %173 = vector.shape_cast %170 : vector<2x128xf32> to vector<1x1x2x128xf32>
    tpu.vector_store %arg7[%c0_67, %c1_68, %c0_69, %c0_70], %173 {strides = array<i32>} : memref<1x3x2x128xf32, #tpu.memory_space<vmem>>, vector<1x1x2x128xf32>,
    %c8 = arith.constant 8 : index
    %174 = memref.load %arg3[%c8] : memref<36xf32, #tpu.memory_space<smem>>
    %175 = vector.broadcast %174 : f32 to vector<2x128xf32>
    %176 = arith.mulf %175, %1 : vector<2x128xf32>
    %c9 = arith.constant 9 : index
    %177 = memref.load %arg3[%c9] : memref<36xf32, #tpu.memory_space<smem>>
    %178 = vector.broadcast %177 : f32 to vector<2x128xf32>
    %179 = arith.mulf %178, %3 : vector<2x128xf32>
    %180 = arith.addf %176, %179 : vector<2x128xf32>
    %c10 = arith.constant 10 : index
    %181 = memref.load %arg3[%c10] : memref<36xf32, #tpu.memory_space<smem>>
    %182 = vector.broadcast %181 : f32 to vector<2x128xf32>
    %183 = arith.mulf %182, %5 : vector<2x128xf32>
    %184 = arith.addf %180, %183 : vector<2x128xf32>
    %c11 = arith.constant 11 : index
    %185 = memref.load %arg3[%c11] : memref<36xf32, #tpu.memory_space<smem>>
    %186 = vector.broadcast %185 : f32 to vector<2x128xf32>
    %187 = arith.mulf %186, %7 : vector<2x128xf32>
    %188 = arith.addf %184, %187 : vector<2x128xf32>
    %c2_71 = arith.constant 2 : index
    %189 = memref.load %arg4[%c2_71] : memref<9xf32, #tpu.memory_space<smem>>
    %190 = vector.broadcast %189 : f32 to vector<2x128xf32>
    %191 = arith.addf %188, %190 : vector<2x128xf32>
    %cst_72 = arith.constant 0.000000e+00 : f32
    %192 = vector.broadcast %cst_72 : f32 to vector<2x128xf32>
    %193 = arith.maximumf %191, %192 : vector<2x128xf32>
    %c0_73 = arith.constant 0 : index
    %c0_74 = arith.constant 0 : index
    %c2_75 = arith.constant 2 : index
    %c0_76 = arith.constant 0 : index
    %c0_77 = arith.constant 0 : index
    %194 = vector.load %arg6[%c0_73, %c0_74, %c2_75, %c0_76, %c0_77] : memref<3x1x3x2x128xf32, #tpu.memory_space<vmem>>, vector<1x1x1x2x128xf32>
    %195 = vector.shape_cast %194 : vector<1x1x1x2x128xf32> to vector<2x128xf32>
    %196 = vector.shape_cast %193 : vector<2x128xf32> to vector<1x1x1x2x128xf32>
    tpu.vector_store %arg6[%c0_73, %c0_74, %c2_75, %c0_76, %c0_77], %196 {strides = array<i32>} : memref<3x1x3x2x128xf32, #tpu.memory_space<vmem>>, vector<1x1x1x2x128xf32>,
    %c0_78 = arith.constant 0 : index
    %197 = memref.load %arg2[%c0_78] : memref<3xf32, #tpu.memory_space<smem>>
    %198 = vector.broadcast %197 : f32 to vector<2x128xf32>
    %199 = arith.mulf %198, %193 : vector<2x128xf32>
    %c20 = arith.constant 20 : index
    %200 = memref.load %arg3[%c20] : memref<36xf32, #tpu.memory_space<smem>>
    %201 = vector.broadcast %200 : f32 to vector<2x128xf32>
    %202 = arith.mulf %201, %1 : vector<2x128xf32>
    %c21 = arith.constant 21 : index
    %203 = memref.load %arg3[%c21] : memref<36xf32, #tpu.memory_space<smem>>
    %204 = vector.broadcast %203 : f32 to vector<2x128xf32>
    %205 = arith.mulf %204, %3 : vector<2x128xf32>
    %206 = arith.addf %202, %205 : vector<2x128xf32>
    %c22 = arith.constant 22 : index
    %207 = memref.load %arg3[%c22] : memref<36xf32, #tpu.memory_space<smem>>
    %208 = vector.broadcast %207 : f32 to vector<2x128xf32>
    %209 = arith.mulf %208, %5 : vector<2x128xf32>
    %210 = arith.addf %206, %209 : vector<2x128xf32>
    %c23 = arith.constant 23 : index
    %211 = memref.load %arg3[%c23] : memref<36xf32, #tpu.memory_space<smem>>
    %212 = vector.broadcast %211 : f32 to vector<2x128xf32>
    %213 = arith.mulf %212, %7 : vector<2x128xf32>
    %214 = arith.addf %210, %213 : vector<2x128xf32>
    %c5_79 = arith.constant 5 : index
    %215 = memref.load %arg4[%c5_79] : memref<9xf32, #tpu.memory_space<smem>>
    %216 = vector.broadcast %215 : f32 to vector<2x128xf32>
    %217 = arith.addf %214, %216 : vector<2x128xf32>
    %cst_80 = arith.constant 0.000000e+00 : f32
    %218 = vector.broadcast %cst_80 : f32 to vector<2x128xf32>
    %219 = arith.maximumf %217, %218 : vector<2x128xf32>
    %c1_81 = arith.constant 1 : index
    %c0_82 = arith.constant 0 : index
    %c2_83 = arith.constant 2 : index
    %c0_84 = arith.constant 0 : index
    %c0_85 = arith.constant 0 : index
    %220 = vector.load %arg6[%c1_81, %c0_82, %c2_83, %c0_84, %c0_85] : memref<3x1x3x2x128xf32, #tpu.memory_space<vmem>>, vector<1x1x1x2x128xf32>
    %221 = vector.shape_cast %220 : vector<1x1x1x2x128xf32> to vector<2x128xf32>
    %222 = vector.shape_cast %219 : vector<2x128xf32> to vector<1x1x1x2x128xf32>
    tpu.vector_store %arg6[%c1_81, %c0_82, %c2_83, %c0_84, %c0_85], %222 {strides = array<i32>} : memref<3x1x3x2x128xf32, #tpu.memory_space<vmem>>, vector<1x1x1x2x128xf32>,
    %c1_86 = arith.constant 1 : index
    %223 = memref.load %arg2[%c1_86] : memref<3xf32, #tpu.memory_space<smem>>
    %224 = vector.broadcast %223 : f32 to vector<2x128xf32>
    %225 = arith.mulf %224, %219 : vector<2x128xf32>
    %226 = arith.addf %199, %225 : vector<2x128xf32>
    %c32 = arith.constant 32 : index
    %227 = memref.load %arg3[%c32] : memref<36xf32, #tpu.memory_space<smem>>
    %228 = vector.broadcast %227 : f32 to vector<2x128xf32>
    %229 = arith.mulf %228, %1 : vector<2x128xf32>
    %c33 = arith.constant 33 : index
    %230 = memref.load %arg3[%c33] : memref<36xf32, #tpu.memory_space<smem>>
    %231 = vector.broadcast %230 : f32 to vector<2x128xf32>
    %232 = arith.mulf %231, %3 : vector<2x128xf32>
    %233 = arith.addf %229, %232 : vector<2x128xf32>
    %c34 = arith.constant 34 : index
    %234 = memref.load %arg3[%c34] : memref<36xf32, #tpu.memory_space<smem>>
    %235 = vector.broadcast %234 : f32 to vector<2x128xf32>
    %236 = arith.mulf %235, %5 : vector<2x128xf32>
    %237 = arith.addf %233, %236 : vector<2x128xf32>
    %c35 = arith.constant 35 : index
    %238 = memref.load %arg3[%c35] : memref<36xf32, #tpu.memory_space<smem>>
    %239 = vector.broadcast %238 : f32 to vector<2x128xf32>
    %240 = arith.mulf %239, %7 : vector<2x128xf32>
    %241 = arith.addf %237, %240 : vector<2x128xf32>
    %c8_87 = arith.constant 8 : index
    %242 = memref.load %arg4[%c8_87] : memref<9xf32, #tpu.memory_space<smem>>
    %243 = vector.broadcast %242 : f32 to vector<2x128xf32>
    %244 = arith.addf %241, %243 : vector<2x128xf32>
    %cst_88 = arith.constant 0.000000e+00 : f32
    %245 = vector.broadcast %cst_88 : f32 to vector<2x128xf32>
    %246 = arith.maximumf %244, %245 : vector<2x128xf32>
    %c2_89 = arith.constant 2 : index
    %c0_90 = arith.constant 0 : index
    %c2_91 = arith.constant 2 : index
    %c0_92 = arith.constant 0 : index
    %c0_93 = arith.constant 0 : index
    %247 = vector.load %arg6[%c2_89, %c0_90, %c2_91, %c0_92, %c0_93] : memref<3x1x3x2x128xf32, #tpu.memory_space<vmem>>, vector<1x1x1x2x128xf32>
    %248 = vector.shape_cast %247 : vector<1x1x1x2x128xf32> to vector<2x128xf32>
    %249 = vector.shape_cast %246 : vector<2x128xf32> to vector<1x1x1x2x128xf32>
    tpu.vector_store %arg6[%c2_89, %c0_90, %c2_91, %c0_92, %c0_93], %249 {strides = array<i32>} : memref<3x1x3x2x128xf32, #tpu.memory_space<vmem>>, vector<1x1x1x2x128xf32>,
    %c2_94 = arith.constant 2 : index
    %250 = memref.load %arg2[%c2_94] : memref<3xf32, #tpu.memory_space<smem>>
    %251 = vector.broadcast %250 : f32 to vector<2x128xf32>
    %252 = arith.mulf %251, %246 : vector<2x128xf32>
    %253 = arith.addf %226, %252 : vector<2x128xf32>
    %c0_95 = arith.constant 0 : index
    %c2_96 = arith.constant 2 : index
    %c0_97 = arith.constant 0 : index
    %c0_98 = arith.constant 0 : index
    %254 = vector.load %arg7[%c0_95, %c2_96, %c0_97, %c0_98] : memref<1x3x2x128xf32, #tpu.memory_space<vmem>>, vector<1x1x2x128xf32>
    %255 = vector.shape_cast %254 : vector<1x1x2x128xf32> to vector<2x128xf32>
    %256 = vector.shape_cast %253 : vector<2x128xf32> to vector<1x1x2x128xf32>
    tpu.vector_store %arg7[%c0_95, %c2_96, %c0_97, %c0_98], %256 {strides = array<i32>} : memref<1x3x2x128xf32, #tpu.memory_space<vmem>>, vector<1x1x2x128xf32>,
    return
  }
  func.func @transform_0(%arg0: i32, %arg1: i32) -> i32 {
    %c0_i32 = arith.constant 0 : i32
    %c0_i32_0 = arith.constant 0 : i32
    return %c0_i32 : i32
  }
  func.func @transform_1(%arg0: i32, %arg1: i32) -> i32 {
    %c0_i32 = arith.constant 0 : i32
    %c0_i32_0 = arith.constant 0 : i32
    return %c0_i32 : i32
  }
  func.func @transform_2(%arg0: i32, %arg1: i32) -> i32 {
    %c0_i32 = arith.constant 0 : i32
    %c0_i32_0 = arith.constant 0 : i32
    return %c0_i32 : i32
  }
  func.func @transform_3(%arg0: i32, %arg1: i32) -> (i32, i32, i32, i32) {
    %c0_i32 = arith.constant 0 : i32
    %c0_i32_0 = arith.constant 0 : i32
    %c0_i32_1 = arith.constant 0 : i32
    return %arg0, %c0_i32, %arg1, %c0_i32_0 : i32, i32, i32, i32
  }
  func.func @transform_4(%arg0: i32, %arg1: i32) -> (i32, i32, i32, i32, i32) {
    %c0_i32 = arith.constant 0 : i32
    %c0_i32_0 = arith.constant 0 : i32
    %c0_i32_1 = arith.constant 0 : i32
    %c0_i32_2 = arith.constant 0 : i32
    return %c0_i32, %arg0, %c0_i32_0, %arg1, %c0_i32_1 : i32, i32, i32, i32, i32
  }
  func.func @transform_5(%arg0: i32, %arg1: i32) -> (i32, i32, i32, i32) {
    %c0_i32 = arith.constant 0 : i32
    %c0_i32_0 = arith.constant 0 : i32
    %c0_i32_1 = arith.constant 0 : i32
    return %arg0, %c0_i32, %arg1, %c0_i32_0 : i32, i32, i32, i32
  }
}

</mosaic_0001>

<bundles_post_ra>
// kernel: squeeze.5
= control target key start
LH: loop header
LB: loop body
LE: loop exit
PB: predicated region body
PF: predicated region fallthrough
CT: control target
= control target key end

     0   :  { %vm31_vm0 = vcmask 130048   ;;  %vm61_vm1 = vcmask 1047556   ;;  %s234_s20 = smov 112   ;;  %s235_s2 = smov 80   ;;  %s376_s0 = inlined_call_operand.vmem [shape: f32[1,2,3,256], index: 0, kind: input, shape index: {}]   ;;  %s377_s1 = inlined_call_operand.vmem [shape: f32[2,3,16,16], index: 1, kind: output, shape index: {}]  }
   0x1   :  { %v195_v0 = vld [vmem:[%s376_s0 + $0xa] sm:$0x3]  ;;  %v196_v1 = vld [vmem:[%s376_s0 + $0x8] sm:$0x3]  ;;  %v197_v2 = vld [vmem:[%s376_s0 + $0x6] sm:$0x3] }
   0x2   :  { %8 = vst [vmem:[#allocation0 + $0x28] sm:$0x3] %v195_v0  ;;  %13 = vst [vmem:[#allocation0 + $0x20] sm:$0x3] %v196_v1  ;;  %v198_v3 = vld [vmem:[%s376_s0 + $0x4] sm:$0x3] }
   0x3   :  { %18 = vst [vmem:[#allocation0 + $0x18] sm:$0x3] %v197_v2  ;;  %23 = vst [vmem:[#allocation0 + $0x10] sm:$0x3] %v198_v3  ;;  %v199_v4 = vld [vmem:[%s376_s0 + $0x2] sm:$0x3] }
   0x4   :  { %v28_v5 = vld [vmem:[%s376_s0] sm:$0x3]  ;;  %27 = vst [vmem:[#allocation0 + $0x8] sm:$0x3] %v199_v4  ;;  %s233_s0 = smov 96   ;;  %s236_s3 = smov 64  }
   0x5   :  { %29 = vst [vmem:[#allocation0] sm:$0x3] %v28_v5  ;;  %s237_s4 = smov 48   ;;  %s238_s5 = smov 32  }
   0x6   :  { %s239_s6 = smov 16  }
   0x9   :  { %v90_v6 = vld.sshfl [vmem:[#allocation0 + $0x20] sm:$0xff pattern:$0x99999180]  }
   0xa   :  { %v49_v7 = vld [vmem:[#allocation0 + $0x20] sm:$0x3]   ;;  %91 = vrot.lane.b32.xlu1 %v90_v6, %s233_s0  ;;  %72 = vrot.lane.b32.xlu0 %v90_v6, %s234_s20  ;;  %v54_v8 = vld [vmem:[#allocation0 + $0x28] sm:$0x3]   ;;  %v39_v14 = vld [vmem:[#allocation0 + $0x10] sm:$0x3]  }
   0xb   :  { %203 = vst.msk [vmem:[%s377_s1 + $0x40] ss:$16 sm:$0x3] %vm31_vm0, %v49_v7   ;;  %v60_v9 = vld.sshfl [vmem:[#allocation0 + $0x10] sm:$0xff pattern:$0x91800000]  }
   0xc   :  { %204 = vst.msk [vmem:[%s377_s1 + $0x48] ss:$16 sm:$0x3] %vm31_vm0, %v54_v8   ;;  %v58_v10 = vld.sshfl [vmem:[#allocation0] sm:$0xff pattern:$0x99999180]  }
   0xd   :  { %v30_v11 = vld [vmem:[#allocation0] sm:$0x3]   ;;  %v62_v12 = vsel %vm61_vm1, %v60_v9, %v58_v10  ;;  %v34_v13 = vld [vmem:[#allocation0 + $0x8] sm:$0x3]   ;;  %v44_v15 = vld [vmem:[#allocation0 + $0x18] sm:$0x3]  }
   0xe   :  { %32 = vst.msk [vmem:[%s377_s1] ss:$16 sm:$0x3] %vm31_vm0, %v30_v11   ;;  %200 = vst.msk [vmem:[%s377_s1 + $0x8] ss:$16 sm:$0x3] %vm31_vm0, %v34_v13   ;;  %110 = vrot.lane.b32.xlu1 %v90_v6, %s235_s2  ;;  %63 = vrot.lane.b32.xlu0 %v62_v12, %s234_s20 }
   0xf   :  { %201 = vst.msk [vmem:[%s377_s1 + $0x20] ss:$16 sm:$0x3] %vm31_vm0, %v39_v14   ;;  %202 = vst.msk [vmem:[%s377_s1 + $0x28] ss:$16 sm:$0x3] %vm31_vm0, %v44_v15  }
  0x12   :  { %82 = vrot.lane.b32.xlu1 %v62_v12, %s233_s0  ;;  %101 = vrot.lane.b32.xlu0 %v62_v12, %s235_s2 }
  0x16   :  { %129 = vrot.lane.b32.xlu1 %v90_v6, %s236_s3  ;;  %120 = vrot.lane.b32.xlu0 %v62_v12, %s236_s3 }
  0x1a   :  { %148 = vrot.lane.b32.xlu1 %v90_v6, %s237_s4  ;;  %139 = vrot.lane.b32.xlu0 %v62_v12, %s237_s4 }
  0x1e   :  { %167 = vrot.lane.b32.xlu1 %v90_v6, %s238_s5  ;;  %158 = vrot.lane.b32.xlu0 %v62_v12, %s238_s5 }
  0x22   :  { %186 = vrot.lane.b32.xlu1 %v90_v6, %s239_s6  ;;  %177 = vrot.lane.b32.xlu0 %v62_v12, %s239_s6 }
  0x7c   :  { %v92_v16 = vpop.permute.xlu1 %91   ;;  %v73_v17 = vpop.permute.xlu0 %72  }
  0x7d   :  { %210 = vst.msk [vmem:[%s377_s1 + $0x42] ss:$8 sm:$0xf] %vm31_vm0, %v92_v16   ;;  %207 = vst.msk [vmem:[%s377_s1 + $0x41] ss:$8 sm:$0xf] %vm31_vm0, %v73_v17  }
  0x80   :  { %v111_v18 = vpop.permute.xlu1 %110   ;;  %v64_v19 = vpop.permute.xlu0 %63  }
  0x81   :  { %213 = vst.msk [vmem:[%s377_s1 + $0x43] ss:$8 sm:$0xf] %vm31_vm0, %v111_v18   ;;  %205 = vst.msk [vmem:[%s377_s1 + $0x1] ss:$8 sm:$0xf] %vm31_vm0, %v64_v19  }
  0x82   :  { %206 = vst.msk [vmem:[%s377_s1 + $0x1] ss:$8 sm:$0xf0] %vm31_vm0, %v64_v19  }
  0x84   :  { %v83_v20 = vpop.permute.xlu1 %82   ;;  %v102_v21 = vpop.permute.xlu0 %101  }
  0x85   :  { %208 = vst.msk [vmem:[%s377_s1 + $0x2] ss:$8 sm:$0xf] %vm31_vm0, %v83_v20   ;;  %209 = vst.msk [vmem:[%s377_s1 + $0x2] ss:$8 sm:$0xf0] %vm31_vm0, %v83_v20  }
  0x86   :  { %211 = vst.msk [vmem:[%s377_s1 + $0x3] ss:$8 sm:$0xf] %vm31_vm0, %v102_v21   ;;  %212 = vst.msk [vmem:[%s377_s1 + $0x3] ss:$8 sm:$0xf0] %vm31_vm0, %v102_v21  }
  0x88   :  { %v130_v22 = vpop.permute.xlu1 %129   ;;  %v121_v23 = vpop.permute.xlu0 %120  }
  0x89   :  { %216 = vst.msk [vmem:[%s377_s1 + $0x44] ss:$8 sm:$0xf] %vm31_vm0, %v130_v22   ;;  %214 = vst.msk [vmem:[%s377_s1 + $0x4] ss:$8 sm:$0xf] %vm31_vm0, %v121_v23  }
  0x8a   :  { %215 = vst.msk [vmem:[%s377_s1 + $0x4] ss:$8 sm:$0xf0] %vm31_vm0, %v121_v23  }
  0x8c   :  { %v149_v24 = vpop.permute.xlu1 %148   ;;  %v140_v25 = vpop.permute.xlu0 %139  }
  0x8d   :  { %219 = vst.msk [vmem:[%s377_s1 + $0x45] ss:$8 sm:$0xf] %vm31_vm0, %v149_v24   ;;  %217 = vst.msk [vmem:[%s377_s1 + $0x5] ss:$8 sm:$0xf] %vm31_vm0, %v140_v25  }
  0x8e   :  { %218 = vst.msk [vmem:[%s377_s1 + $0x5] ss:$8 sm:$0xf0] %vm31_vm0, %v140_v25  }
  0x90   :  { %v168_v26 = vpop.permute.xlu1 %167   ;;  %v159_v27 = vpop.permute.xlu0 %158  }
  0x91   :  { %222 = vst.msk [vmem:[%s377_s1 + $0x46] ss:$8 sm:$0xf] %vm31_vm0, %v168_v26   ;;  %220 = vst.msk [vmem:[%s377_s1 + $0x6] ss:$8 sm:$0xf] %vm31_vm0, %v159_v27  }
  0x92   :  { %221 = vst.msk [vmem:[%s377_s1 + $0x6] ss:$8 sm:$0xf0] %vm31_vm0, %v159_v27  }
  0x94   :  { %v187_v28 = vpop.permute.xlu1 %186   ;;  %v178_v29 = vpop.permute.xlu0 %177  }
  0x95   :  { %225 = vst.msk [vmem:[%s377_s1 + $0x47] ss:$8 sm:$0xf] %vm31_vm0, %v187_v28   ;;  %223 = vst.msk [vmem:[%s377_s1 + $0x7] ss:$8 sm:$0xf] %vm31_vm0, %v178_v29  }
  0x96   :  { %224 = vst.msk [vmem:[%s377_s1 + $0x7] ss:$8 sm:$0xf0] %vm31_vm0, %v178_v29  }

// kernel: squeeze.3
= control target key start
LH: loop header
LB: loop body
LE: loop exit
PB: predicated region body
PF: predicated region fallthrough
CT: control target
= control target key end

     0   :  { %s318_s0 = inlined_call_operand.vmem [shape: f32[1,2,3,2,128], index: 0, kind: input, shape index: {}]   ;;  %s319_s1 = inlined_call_operand.hbm [shape: f32[2,3,16,16], index: 1, kind: output, shape index: {}]  }
   0x1   :  { %v206_v0 = vld [vmem:[%s318_s0 + $0xa] sm:$0x3]  ;;  %v207_v1 = vld [vmem:[%s318_s0 + $0x8] sm:$0x3]  ;;  %v208_v2 = vld [vmem:[%s318_s0 + $0x6] sm:$0x3] }
   0x2   :  { %9 = vst [vmem:[#allocation2 + $0x28] sm:$0x3] %v206_v0  ;;  %14 = vst [vmem:[#allocation2 + $0x20] sm:$0x3] %v207_v1  ;;  %v209_v3 = vld [vmem:[%s318_s0 + $0x4] sm:$0x3] }
   0x3   :  { %19 = vst [vmem:[#allocation2 + $0x18] sm:$0x3] %v208_v2  ;;  %24 = vst [vmem:[#allocation2 + $0x10] sm:$0x3] %v209_v3  ;;  %v210_v4 = vld [vmem:[%s318_s0 + $0x2] sm:$0x3] }
   0x4   :  { %v29_v5 = vld [vmem:[%s318_s0] sm:$0x3]  ;;  %28 = vst [vmem:[#allocation2 + $0x8] sm:$0x3] %v210_v4 }
   0x5   :  { %30 = vst [vmem:[#allocation2] sm:$0x3] %v29_v5 }
   0x6   :  { %2 = vsyncpa [#allocation1], 0  ;;  %vm32_vm0 = vcmask 130048   ;;  %vm62_vm1 = vcmask 1047556   ;;  %s243_s0 = smov 96   ;;  %s244_s18 = smov 112  }
   0x7   :  { %s245_s19 = smov 80   ;;  %s246_s20 = smov 64  }
   0x8   :  { %s247_s21 = smov 48   ;;  %s248_s22 = smov 32  }
   0x9   :  { %v50_v6 = vld [vmem:[#allocation2 + $0x20] sm:$0x3]   ;;  %v55_v8 = vld [vmem:[#allocation2 + $0x28] sm:$0x3]   ;;  %s249_s23 = smov 16   ;;  %s250_s24 = smov [#allocation0]  }
   0xa   :  { %v91_v7 = vld.sshfl [vmem:[#allocation2 + $0x20] sm:$0xff pattern:$0x99999810]   ;;  %53 = vst.msk [vmem:[#allocation0 + $0x40] ss:$8 sm:$0x3] %vm32_vm0, %v50_v6  }
   0xb   :  { %92 = vrot.lane.b32.xlu1 %v91_v7, %s243_s0  ;;  %73 = vrot.lane.b32.xlu0 %v91_v7, %s244_s18  ;;  %v61_v9 = vld.sshfl [vmem:[#allocation2 + $0x10] sm:$0xff pattern:$0x98100000]   ;;  %58 = vst.msk [vmem:[#allocation0 + $0x50] ss:$8 sm:$0x3] %vm32_vm0, %v55_v8  }
   0xc   :  { %v59_v10 = vld.sshfl [vmem:[#allocation2] sm:$0xff pattern:$0x99999810]   ;;  %v40_v14 = vld [vmem:[#allocation2 + $0x10] sm:$0x3]   ;;  %s196_s25 = sshll.u32 %s250_s24, 4  ;;  %s197_s25 = int_to_ptr.vmem [resolvable:$true] %s196_s25 }
   0xd   :  { %v31_v11 = vld [vmem:[#allocation2] sm:$0x3]   ;;  %v63_v12 = vsel %vm62_vm1, %v61_v9, %v59_v10  ;;  %v35_v13 = vld [vmem:[#allocation2 + $0x8] sm:$0x3]   ;;  %v45_v15 = vld [vmem:[#allocation2 + $0x18] sm:$0x3]   ;;  %p224_p1 = scmp.lt.s32.totalorder %s197_s25, %s197_s25 }
   0xe   :  { %33 = vst.msk [vmem:[#allocation0] ss:$8 sm:$0x3] %vm32_vm0, %v31_v11   ;;  %38 = vst.msk [vmem:[#allocation0 + $0x10] ss:$8 sm:$0x3] %vm32_vm0, %v35_v13  }
   0xf   :  { %43 = vst.msk [vmem:[#allocation0 + $0x20] ss:$8 sm:$0x3] %vm32_vm0, %v40_v14   ;;  %48 = vst.msk [vmem:[#allocation0 + $0x30] ss:$8 sm:$0x3] %vm32_vm0, %v45_v15   ;;  %111 = vrot.lane.b32.xlu1 %v91_v7, %s245_s19  ;;  %64 = vrot.lane.b32.xlu0 %v63_v12, %s244_s18 }
  0x10   :  { %s219_s26 = scalar_lea.vmem %s197_s25, 1536 }
  0x11   :  { %p220_p0 = scmp.ne.s32.totalorder %s197_s25, %s219_s26  ;;  %p225_p2 = scmp.lt.s32.totalorder %s219_s26, %s219_s26 }
  0x13   :  { %83 = vrot.lane.b32.xlu1 %v63_v12, %s243_s0  ;;  %102 = vrot.lane.b32.xlu0 %v63_v12, %s245_s19  ;;  %p226_p3 = por %p225_p2, %p224_p1 }
  0x15   :  { %p227_p4 = pnand %p226_p3, %p220_p0 }
  0x17   :  { %130 = vrot.lane.b32.xlu1 %v91_v7, %s246_s20  ;;  %121 = vrot.lane.b32.xlu0 %v63_v12, %s246_s20 }
  0x1b   :  { %149 = vrot.lane.b32.xlu1 %v91_v7, %s247_s21  ;;  %140 = vrot.lane.b32.xlu0 %v63_v12, %s247_s21 }
  0x1f   :  { %168 = vrot.lane.b32.xlu1 %v91_v7, %s248_s22  ;;  %159 = vrot.lane.b32.xlu0 %v63_v12, %s248_s22 }
  0x23   :  { %187 = vrot.lane.b32.xlu1 %v91_v7, %s249_s23  ;;  %178 = vrot.lane.b32.xlu0 %v63_v12, %s249_s23 }
  0x7d   :  { %v93_v16 = vpop.permute.xlu1 %92   ;;  %v74_v17 = vpop.permute.xlu0 %73  }
  0x7e   :  { %96 = vst.msk [vmem:[#allocation0 + $0x42] ss:$8 sm:$0xf] %vm32_vm0, %v93_v16   ;;  %77 = vst.msk [vmem:[#allocation0 + $0x41] ss:$8 sm:$0xf] %vm32_vm0, %v74_v17  }
  0x81   :  { %v112_v18 = vpop.permute.xlu1 %111   ;;  %v65_v19 = vpop.permute.xlu0 %64  }
  0x82   :  { %115 = vst.msk [vmem:[#allocation0 + $0x43] ss:$8 sm:$0xf] %vm32_vm0, %v112_v18   ;;  %68 = vst.msk [vmem:[#allocation0 + $0x1] ss:$8 sm:$0xf] %vm32_vm0, %v65_v19  }
  0x83   :  { %70 = vst.msk [vmem:[#allocation0 + $0x1] ss:$8 sm:$0xf0] %vm32_vm0, %v65_v19  }
  0x85   :  { %v84_v20 = vpop.permute.xlu1 %83   ;;  %v103_v21 = vpop.permute.xlu0 %102  }
  0x86   :  { %87 = vst.msk [vmem:[#allocation0 + $0x2] ss:$8 sm:$0xf] %vm32_vm0, %v84_v20   ;;  %89 = vst.msk [vmem:[#allocation0 + $0x2] ss:$8 sm:$0xf0] %vm32_vm0, %v84_v20  }
  0x87   :  { %106 = vst.msk [vmem:[#allocation0 + $0x3] ss:$8 sm:$0xf] %vm32_vm0, %v103_v21   ;;  %108 = vst.msk [vmem:[#allocation0 + $0x3] ss:$8 sm:$0xf0] %vm32_vm0, %v103_v21  }
  0x89   :  { %v131_v22 = vpop.permute.xlu1 %130   ;;  %v122_v23 = vpop.permute.xlu0 %121  }
  0x8a   :  { %134 = vst.msk [vmem:[#allocation0 + $0x44] ss:$8 sm:$0xf] %vm32_vm0, %v131_v22   ;;  %125 = vst.msk [vmem:[#allocation0 + $0x4] ss:$8 sm:$0xf] %vm32_vm0, %v122_v23  }
  0x8b   :  { %127 = vst.msk [vmem:[#allocation0 + $0x4] ss:$8 sm:$0xf0] %vm32_vm0, %v122_v23  }
  0x8d   :  { %v150_v24 = vpop.permute.xlu1 %149   ;;  %v141_v25 = vpop.permute.xlu0 %140  }
  0x8e   :  { %153 = vst.msk [vmem:[#allocation0 + $0x45] ss:$8 sm:$0xf] %vm32_vm0, %v150_v24   ;;  %144 = vst.msk [vmem:[#allocation0 + $0x5] ss:$8 sm:$0xf] %vm32_vm0, %v141_v25  }
  0x8f   :  { %146 = vst.msk [vmem:[#allocation0 + $0x5] ss:$8 sm:$0xf0] %vm32_vm0, %v141_v25  }
  0x91   :  { %v169_v26 = vpop.permute.xlu1 %168   ;;  %v160_v27 = vpop.permute.xlu0 %159  }
  0x92   :  { %172 = vst.msk [vmem:[#allocation0 + $0x46] ss:$8 sm:$0xf] %vm32_vm0, %v169_v26   ;;  %163 = vst.msk [vmem:[#allocation0 + $0x6] ss:$8 sm:$0xf] %vm32_vm0, %v160_v27  }
  0x93   :  { %165 = vst.msk [vmem:[#allocation0 + $0x6] ss:$8 sm:$0xf0] %vm32_vm0, %v160_v27  }
  0x95   :  { %v188_v28 = vpop.permute.xlu1 %187   ;;  %v179_v29 = vpop.permute.xlu0 %178  }
  0x96   :  { %191 = vst.msk [vmem:[#allocation0 + $0x47] ss:$8 sm:$0xf] %vm32_vm0, %v188_v28   ;;  %182 = vst.msk [vmem:[#allocation0 + $0x7] ss:$8 sm:$0xf] %vm32_vm0, %v179_v29  }
  0x97   :  { %184 = vst.msk [vmem:[#allocation0 + $0x7] ss:$8 sm:$0xf0] %vm32_vm0, %v179_v29  }
  0x98   :  { %230 = shalt.err (!%p227_p4)
}
  0x99   :  { %s231_s29 = scalar_lea.hbm %s319_s1, 1536 }
  0x9a   :  { %p232_p5 = scmp.ne.s32.totalorder %s319_s1, %s231_s29  ;;  %p235_p6 = scmp.lt.u32.totalorder %s231_s29, %s319_s1 }
  0x9c   :  { %p237_p7 = pnand %p235_p6, %p232_p5 }
  0x9e   :  { %240 = shalt.err (!%p237_p7)
}
  0x9f   :  { %199 = dma.vmem_to_hbm [thread:$0]  %s197_s25, 1536, %s319_s1, [#allocation1]  }
  0xa0   :  { %241 = dma.done.wait [#allocation1], 1536  }
  0xa1   :  { %242 = vsyncadd [#allocation1], 4294965760 }
  0xa2   :  { %201 = vsyncpa [#allocation1], 1 }

// kernel: ensemble_forward.1
= control target key start
LH: loop header
LB: loop body
LE: loop exit
PB: predicated region body
PF: predicated region fallthrough
CT: control target
= control target key end

     0   :  { %s1374_s0 = inlined_call_operand.vmem [shape: f32[3], index: 0, kind: input, shape index: {}]   ;;  %s1375_s1 = inlined_call_operand.vmem [shape: f32[36], index: 1, kind: input, shape index: {}]   ;;  %s1376_s2 = inlined_call_operand.vmem [shape: f32[9], index: 2, kind: input, shape index: {}]   ;;  %s1377_s3 = inlined_call_operand.vmem [shape: f32[2,4,2,128], index: 3, kind: input, shape index: {}]   ;;  %s1378_s4 = inlined_call_operand.vmem [shape: f32[3,2,3,2,128], index: 4, kind: output, shape index: {0}]   ;;  %s1379_s5 = inlined_call_operand.vmem [shape: f32[2,3,2,128], index: 5, kind: output, shape index: {1}]  }
   0x1   :  { %1383 = sst [smem:[#allocation10_spill]] %s1374_s0 }
   0x2   :  { %11 = vsyncpa [#allocation3], 0 }
   0x3   :  { %12 = vsyncpa [#allocation5], 0  ;;  %s1044_s18 = smov 0   ;;  %s1046_s19 = smov 0  }
   0x4   :  { %s1048_s20 = smov 0   ;;  %s1050_s21 = smov 0  }
   0x5   :  { %s1052_s22 = smov 0  }
   0x6 LB: > { %s764_s23 = sadd.s32 4294967295, %s1009_s22   ;;  %s30_s24 = sadd.s32 1, %s1005_s21  ;;  %s1009_s22 = sphi %s1052_s22, %s18_s22   ;;  %s1005_s21 = sphi %s1050_s21, %s1395_s21   ;;  %s1001_s20 = sphi %s1048_s20, %s1394_s20   ;;  %s997_s19 = sphi %s1046_s19, %s1393_s19   ;;  %s993_s18 = sphi %s1044_s18, %s1392_s18  }
   0x7   : > { %p32_p0 = scmp.ge.s32.totalorder %s30_s24, 2  ;;  %s130_s25 = sadd.s32 1, %s997_s19 }
   0x8   : > { %p140_p1 = scmp.ne.s32.totalorder %s997_s19, %s993_s18  ;;  %p141_p2 = scmp.eq.s32.totalorder %s764_s23, 1 }
   0x9   : > { %s1397_s24 = smov (%p32_p0, %s30_s24), 0  ;;  %p766_p4 = scmp.ge.s32.totalorder %s1009_s22, 1 }
   0xa   : > { %p1076_p3 = por %p141_p2, %p140_p1  ;;  %s125_s27 = ssub.s32 %s1005_s21, %s1397_s24 }
   0xb   : > { %p182_p5 = scmp.lt.s32.totalorder %s1009_s22, 3  ;;  %p128_p6 = scmp.eq.s32.totalorder %s125_s27, 0 }
   0xc   : > { %s1384_s26 = scalar_select %p1076_p3, 1, 0 }
   0xd   : > { %p1084_p7 = pnand %p766_p4, %p182_p5  ;;  %p1088_p8 = scmp.eq.s32.totalorder %s764_s23, 0 }
   0xe   : > { %s1093_s30 = scalar_select %p128_p6, %s997_s19, %s130_s25  }
   0xf   : > { %s1385_s28 = scalar_select %p1084_p7, 1, 0 }
  0x10   : > { %s1386_s29 = scalar_select %p1088_p8, 1, 0 }
  0x11   : > { %p859_p9 = pneg %p1084_p7  ;;  %s206_s8 = sshll.u32 %s1375_s1, 4  ;;  %s207_s8 = int_to_ptr.vmem [resolvable:$true] %s206_s8 }
  0x12   : > { %s1388_s0 = sld [smem:[#allocation10_spill]]  ;;  %s918_s13 = scalar_lea.vmem %s207_s8, 16 }
  0x13   : > { %p1102_p10 = pnand %p1088_p8, %p859_p9  ;;  %p919_p11 = scmp.ne.s32.totalorder %s207_s8, %s918_s13 }
  0x14   : > { %p926_p1 = scmp.lt.s32.totalorder %s207_s8, %s207_s8  ;;  %p927_p2 = scmp.lt.s32.totalorder %s918_s13, %s918_s13 }
  0x15   : > { %p920_p12 = pneg %p1102_p10 }
  0x16   : > { %p928_p4 = por %p927_p2, %p926_p1 }
  0x17   : > { %p921_p13 = pnand %p920_p12, %p919_p11 }
  0x18   : > { %s195_s12 = sshll.u32 %s1388_s0, 4  ;;  %s196_s12 = int_to_ptr.vmem [resolvable:$true] %s195_s12 }
  0x19   : > { %p922_p0 = pneg %p921_p13 }
  0x1b   : > { %p929_p5 = pnand %p928_p4, %p922_p0 }
  0x1d   : > { %932 = shalt.err (!%p929_p5)
}
  0x1e   : > { %s1011_s14 = smov [#allocation4]   ;;  %s217_s17 = sshll.u32 %s1376_s2, 4  ;;  %s218_s17 = int_to_ptr.vmem [resolvable:$true] %s217_s17 }
  0x1f   : > { %865 = dma.vmem_to_smem (!%p1102_p10), %s207_s8, 16, %s1011_s14, [#allocation5]  }
  0x20   : > { %s933_s23 = scalar_lea.vmem %s196_s12, 16  ;;  %p941_p13 = scmp.lt.s32.totalorder %s196_s12, %s196_s12 }
  0x21   : > { %p934_p6 = scmp.ne.s32.totalorder %s196_s12, %s933_s23  ;;  %p942_p3 = scmp.lt.s32.totalorder %s933_s23, %s933_s23 }
  0x23   : > { %p936_p9 = pnand %p934_p6, %p920_p12  ;;  %p943_p1 = por %p942_p3, %p941_p13 }
  0x25   : > { %p937_p11 = pneg %p936_p9 }
  0x27   : > { %p944_p0 = pnand %p943_p1, %p937_p11 }
  0x29   : > { %947 = shalt.err (!%p944_p0)
}
  0x2a   : > { %s1012_s25 = smov [#allocation2]   ;;  %s948_s27 = scalar_lea.vmem %s218_s17, 16 }
  0x2b   : > { %862 = dma.vmem_to_smem (!%p1102_p10), %s196_s12, 16, %s1012_s25, [#allocation3]  }
  0x2c   : > { %p949_p2 = scmp.ne.s32.totalorder %s218_s17, %s948_s27  ;;  %p956_p8 = scmp.lt.s32.totalorder %s218_s17, %s218_s17 }
  0x2d   : > { %p957_p6 = scmp.lt.s32.totalorder %s948_s27, %s948_s27 }
  0x2e   : > { %p951_p4 = pnand %p949_p2, %p920_p12 }
  0x2f   : > { %p958_p9 = por %p957_p6, %p956_p8 }
  0x30   : > { %p952_p5 = pneg %p951_p4 }
  0x32   : > { %p959_p7 = pnand %p958_p9, %p952_p5 }
  0x34   : > { %962 = shalt.err (!%p959_p7)
}
  0x35   : > { %s1013_s6 = smov [#allocation6]   ;;  %p1389_p3 = scmp.ne.s32.totalorder %s1385_s28, 0 }
  0x36   : > { %868 = dma.vmem_to_smem (!%p1102_p10), %s218_s17, 16, %s1013_s6, [#allocation5]  }
  0x37   : > { %241 = sbr.rel (%p1389_p3) target bundleno = 128 (0x80), region = 36  ;;  %p1390_p11 = scmp.ne.s32.totalorder (!%p1389_p3), %s1386_s29, 0 }
  0x3e   : > { %984 = dma.done.wait (%p1390_p11), [#allocation3], 16  }
  0x3f   : > { %986 = vsyncadd (%p1390_p11), [#allocation3], 4294967280 }
  0x40   : > { %988 = dma.done.wait (%p1390_p11), [#allocation5], 32  }
  0x41   : > { %990 = vsyncadd (%p1390_p11), [#allocation5], 4294967264 }
  0x42   : > { %255 = sfence }
  0x43   : > { %p288_p7 = scmp.lt.s32.totalorder %s1001_s20, 1  ;;  %s311_s7 = sld [smem:[#allocation4]] }
  0x44   : > { %s781_s8 = sld [smem:[#allocation4 + $0x1]]  ;;  %s782_s10 = sld [smem:[#allocation4 + $0x2]] }
  0x45   : > { %s1141_s28 = scalar_select %p288_p7, %s1001_s20, 1 }
  0x46   : > { %s783_s14 = sld [smem:[#allocation4 + $0x3]]  ;;  %s275_s15 = sand.u32 1, %s993_s18  }
  0x47   : > { %s843_s9 = sshll.u32 %s1141_s28, 3  ;;  %s1152_s29 = sld [smem:[#allocation6]] }
  0x48   : > { %s295_s13 = scalar_lea.vmem %s1377_s3, %s843_s9  ;;  %s1154_s16 = sld [smem:[#allocation2]] }
  0x49   : > { %v1148_v0 = vld [vmem:[%s295_s13] sm:$0x3]  ;;  %v1150_v1 = vld [vmem:[%s295_s13 + $0x2] sm:$0x3]  ;;  %v312_v2 = vstv %s311_s7  ;;  %v1156_v3 = vld [vmem:[%s295_s13 + $0x4] sm:$0x3] }
  0x4a   : > { %v313_v4 = vmul.f32 %v312_v2, %v1148_v0  ;;  %s784_s17 = sld [smem:[#allocation4 + $0xc]]  ;;  %s785_s23 = sld [smem:[#allocation4 + $0xd]]  ;;  %v1159_v5 = vld [vmem:[%s295_s13 + $0x6] sm:$0x3]  ;;  %v315_v6 = vstv %s781_s8  ;;  %v319_v8 = vstv %s782_s10 }
  0x4b   : > { %s786_s25 = sld [smem:[#allocation4 + $0xe]]  ;;  %s1161_s18 = sld [smem:[#allocation4 + $0xf]]  ;;  %v316_v7 = vmul.f32 %v1150_v1, %v315_v6  ;;  %v320_v9 = vmul.f32 %v1156_v3, %v319_v8 }
  0x4c   : > { %s1164_s27 = sld [smem:[#allocation6 + $0x3]]  ;;  %s1166_s6 = sld [smem:[#allocation2 + $0x1]]  ;;  %v323_v10 = vstv %s783_s14 }
  0x4d   : > { %s791_s7 = sld [smem:[#allocation4 + $0x18]]  ;;  %s792_s9 = sld [smem:[#allocation4 + $0x19]]  ;;  %v317_v11 = vadd.f32 %v316_v7, %v313_v4  ;;  %v324_v12 = vmul.f32 %v1159_v5, %v323_v10  ;;  %v327_v14 = vstv %s1152_s29 }
  0x4e   : > { %s1170_s8 = sld [smem:[#allocation4 + $0x1a]]  ;;  %s1172_s11 = sld [smem:[#allocation4 + $0x1b]]  ;;  %v1189_v22 = vstv %s1154_s16 }
  0x4f   : > { %s1174_s12 = smul.u32 18, %s275_s15  ;;  %s1176_s10 = sld [smem:[#allocation6 + $0x6]]  ;;  %v321_v13 = vadd.f32 %v320_v9, %v317_v11 }
  0x50   : > { %v335_v15 = vstv %s784_s17  ;;  %v338_v16 = vstv %s785_s23  ;;  %s1179_s13 = sld [smem:[#allocation2 + $0x2]]  ;;  %s1181_s14 = sld [smem:[#allocation4 + $0x4]] }
  0x51   : > { %v336_v17 = vmul.f32 %v335_v15, %v1148_v0  ;;  %v339_v18 = vmul.f32 %v1150_v1, %v338_v16  ;;  %v342_v19 = vstv %s786_s25  ;;  %v346_v20 = vstv %s1161_s18  ;;  %s1186_s0 = sld [smem:[#allocation4 + $0x5]]  ;;  %s1192_s15 = sld [smem:[#allocation4 + $0x6]] }
  0x52   : > { %v325_v21 = vadd.f32 %v324_v12, %v321_v13  ;;  %v343_v23 = vmul.f32 %v1156_v3, %v342_v19  ;;  %s1194_s29 = sld [smem:[#allocation4 + $0x7]]  ;;  %v347_v25 = vmul.f32 %v1159_v5, %v346_v20  ;;  %s1197_s17 = sld [smem:[#allocation4 + $0x10]]  ;;  %v350_v33 = vstv %s1164_s27 }
  0x53   : > { %v340_v24 = vadd.f32 %v339_v18, %v336_v17  ;;  %v360_v26 = vstv %s791_s7  ;;  %v363_v27 = vstv %s792_s9  ;;  %s1202_s16 = sld [smem:[#allocation4 + $0x11]]  ;;  %s1204_s23 = sld [smem:[#allocation4 + $0x12]]  ;;  %v1214_v37 = vstv %s1166_s6 }
  0x54   : > { %v328_v28 = vadd.f32 %v327_v14, %v325_v21  ;;  %v361_v29 = vmul.f32 %v360_v26, %v1148_v0  ;;  %v364_v30 = vmul.f32 %v1150_v1, %v363_v27  ;;  %v367_v31 = vstv %s1170_s8  ;;  %s1209_s25 = sld [smem:[#allocation6 + $0x1]]  ;;  %s1211_s18 = sld [smem:[#allocation4 + $0x13]] }
  0x55   : > { %v344_v32 = vadd.f32 %v343_v23, %v340_v24  ;;  %v368_v34 = vmul.f32 %v1156_v3, %v367_v31  ;;  %v371_v35 = vstv %s1172_s11  ;;  %s1217_s7 = sld [smem:[#allocation4 + $0x1c]]  ;;  %v375_v41 = vstv %s1176_s10  ;;  %s1222_s27 = sld [smem:[#allocation4 + $0x1d]] }
  0x56   : > { %v329_v36 = vmax.f32 %v328_v28, 0.0  ;;  %v365_v38 = vadd.f32 %v364_v30, %v361_v29  ;;  %v372_v39 = vmul.f32 %v1159_v5, %v371_v35  ;;  %v386_v42 = vstv %s1181_s14  ;;  %s1224_s9 = sld [smem:[#allocation4 + $0x1e]]  ;;  %s1227_s8 = scalar_lea.vmem [#allocation7], %s1174_s12 }
  0x57   : > { %v348_v40 = vadd.f32 %v347_v25, %v344_v32  ;;  %v389_v43 = vstv %s1186_s0  ;;  %v1231_v45 = vstv %s1179_s13  ;;  %v387_v46 = vmul.f32 %v386_v42, %v1148_v0  ;;  %s1238_s0 = sld [smem:[#allocation6 + $0x4]]  ;;  %s1240_s6 = sld [smem:[#allocation4 + $0x1f]] }
  0x58   : > { %330 = vst [vmem:[%s1227_s8] sm:$0x3] %v329_v36  ;;  %v369_v44 = vadd.f32 %v368_v34, %v365_v38  ;;  %v390_v47 = vmul.f32 %v1150_v1, %v389_v43  ;;  %v333_v48 = vmul.f32 %v1189_v22, %v329_v36  ;;  %v393_v50 = vstv %s1192_s15  ;;  %s1244_s11 = sld [smem:[#allocation4 + $0x8]]  ;;  %s1249_s12 = sld [smem:[#allocation4 + $0x9]] }
  0x59   : > { %v351_v49 = vadd.f32 %v350_v33, %v348_v40  ;;  %v397_v51 = vstv %s1194_s29  ;;  %v394_v54 = vmul.f32 %v1156_v3, %v393_v50  ;;  %v410_v57 = vstv %s1197_s17  ;;  %s1251_s10 = sld [smem:[#allocation4 + $0xa]]  ;;  %s845_s13 = smul.u32 6, %s1141_s28 }
  0x5a   : > { %v373_v52 = vadd.f32 %v372_v39, %v369_v44  ;;  %v391_v53 = vadd.f32 %v390_v47, %v387_v46  ;;  %v398_v55 = vmul.f32 %v1159_v5, %v397_v51  ;;  %v413_v58 = vstv %s1202_s16  ;;  %s1256_s14 = sld [smem:[#allocation6 + $0x7]]  ;;  %s1263_s15 = sld [smem:[#allocation4 + $0xb]] }
  0x5b   : > { %v352_v56 = vmax.f32 %v351_v49, 0.0  ;;  %v417_v59 = vstv %s1204_s23  ;;  %v411_v62 = vmul.f32 %v410_v57, %v1148_v0  ;;  %v414_v63 = vmul.f32 %v1150_v1, %v413_v58  ;;  %s1266_s28 = sld [smem:[#allocation4 + $0x14]]  ;;  %s1271_s29 = sld [smem:[#allocation4 + $0x15]] }
  0x5c   : > { %v376_v60 = vadd.f32 %v375_v41, %v373_v52  ;;  %v395_v61 = vadd.f32 %v394_v54, %v391_v53  ;;  %v401_v4 = vstv %s1209_s25  ;;  %v418_v6 = vmul.f32 %v1156_v3, %v417_v59  ;;  %s1273_s17 = sld [smem:[#allocation4 + $0x16]]  ;;  %s1279_s25 = scalar_lea.vmem %s1379_s5, %s845_s13 }
  0x5d   : > { %789 = vst [vmem:[%s1227_s8 + $0x6] sm:$0x3] %v352_v56  ;;  %v357_v2 = vmul.f32 %v1214_v37, %v352_v56  ;;  %v421_v7 = vstv %s1211_s18  ;;  %v415_v10 = vadd.f32 %v414_v63, %v411_v62  ;;  %v435_v13 = vstv %s1217_s7  ;;  %s1283_s18 = sld [smem:[#allocation6 + $0x2]]  ;;  %s1289_s7 = sld [smem:[#allocation4 + $0x17]] }
  0x5e   : > { %v377_v8 = vmax.f32 %v376_v60, 0.0  ;;  %v399_v9 = vadd.f32 %v398_v55, %v395_v61  ;;  %v422_v11 = vmul.f32 %v1159_v5, %v421_v7  ;;  %v438_v14 = vstv %s1222_s27  ;;  %s1291_s27 = sld [smem:[#allocation4 + $0x20]]  ;;  %p1391_p8 = scmp.ne.s32.totalorder %s1384_s26, 0 }
  0x5f   : > { %v358_v12 = vadd.f32 %v357_v2, %v333_v48  ;;  %v442_v15 = vstv %s1224_s9  ;;  %v419_v18 = vadd.f32 %v418_v6, %v415_v10  ;;  %v436_v19 = vmul.f32 %v435_v13, %v1148_v0  ;;  %s1297_s9 = sld [smem:[#allocation4 + $0x21]] }
  0x60   : > { %796 = vst [vmem:[%s1227_s8 + $0xc] sm:$0x3] %v377_v8  ;;  %v382_v16 = vmul.f32 %v1231_v45, %v377_v8  ;;  %v402_v17 = vadd.f32 %v401_v4, %v399_v9  ;;  %v425_v20 = vstv %s1238_s0  ;;  %v439_v21 = vmul.f32 %v1150_v1, %v438_v14  ;;  %s1299_s0 = sld [smem:[#allocation4 + $0x22]] }
  0x61   : > { %v443_v23 = vmul.f32 %v1156_v3, %v442_v15  ;;  %v446_v24 = vstv %s1240_s6  ;;  %v423_v27 = vadd.f32 %v422_v11, %v419_v18  ;;  %v462_v30 = vstv %s1244_s11  ;;  %s1309_s6 = sld [smem:[#allocation6 + $0x5]]  ;;  %s1311_s11 = sld [smem:[#allocation4 + $0x23]] }
  0x62   : > { %v383_v25 = vadd.f32 %v382_v16, %v358_v12  ;;  %v403_v26 = vmax.f32 %v402_v17, 0.0  ;;  %v447_v28 = vmul.f32 %v1159_v5, %v446_v24  ;;  %v440_v29 = vadd.f32 %v439_v21, %v436_v19 }
  0x63   : > { %v465_v31 = vstv %s1249_s12  ;;  %v469_v32 = vstv %s1251_s10  ;;  %v426_v33 = vadd.f32 %v425_v20, %v423_v27  ;;  %v450_v34 = vstv %s1256_s14  ;;  %s1325_s12 = sld [smem:[#allocation6 + $0x8]]  ;;  %s846_s10 = smul.u32 (%p1391_p8), 6, %s1001_s20 }
  0x64   : > { %384 = vst [vmem:[%s1279_s25] sm:$0x3] %v383_v25  ;;  %803 = vst [vmem:[%s1227_s8 + $0x2] sm:$0x3] %v403_v26  ;;  %v463_v35 = vmul.f32 %v462_v30, %v1148_v0  ;;  %v466_v36 = vmul.f32 %v1150_v1, %v465_v31  ;;  %v408_v38 = vmul.f32 %v403_v26, %v1189_v22  ;;  %v473_v41 = vstv %s1263_s15 }
  0x65   : > { %v444_v39 = vadd.f32 %v443_v23, %v440_v29  ;;  %v470_v40 = vmul.f32 %v1156_v3, %v469_v32  ;;  %v427_v42 = vmax.f32 %v426_v33, 0.0  ;;  %v474_v44 = vmul.f32 %v1159_v5, %v473_v41  ;;  %s555_s15 = scalar_lea.vmem (%p1391_p8), %s1378_s4, %s846_s10 }
  0x66   : > { %v467_v43 = vadd.f32 %v466_v36, %v463_v35  ;;  %v486_v46 = vstv %s1266_s28  ;;  %v489_v49 = vstv %s1271_s29  ;;  %v493_v50 = vstv %s1273_s17 }
  0x67   : > { %v448_v47 = vadd.f32 %v447_v28, %v444_v39  ;;  %v487_v48 = vmul.f32 %v486_v46, %v1148_v0  ;;  %809 = vst [vmem:[%s1227_s8 + $0x8] sm:$0x3] %v427_v42  ;;  %v432_v51 = vmul.f32 %v427_v42, %v1214_v37  ;;  %v490_v53 = vmul.f32 %v1150_v1, %v489_v49 }
  0x68   : > { %v471_v52 = vadd.f32 %v470_v40, %v467_v43  ;;  %v494_v54 = vmul.f32 %v1156_v3, %v493_v50  ;;  %v477_v56 = vstv %s1283_s18  ;;  %v497_v57 = vstv %s1289_s7 }
  0x69   : > { %v451_v55 = vadd.f32 %v450_v34, %v448_v47  ;;  %v511_v58 = vstv %s1291_s27  ;;  %v433_v59 = vadd.f32 %v432_v51, %v408_v38  ;;  %v491_v61 = vadd.f32 %v490_v53, %v487_v48 }
  0x6a   : > { %v475_v60 = vadd.f32 %v474_v44, %v471_v52  ;;  %v498_v62 = vmul.f32 %v1159_v5, %v497_v57  ;;  %v512_v2 = vmul.f32 %v511_v58, %v1148_v0  ;;  %v514_v4 = vstv %s1297_s9 }
  0x6b   : > { %v452_v63 = vmax.f32 %v451_v55, 0.0  ;;  %v518_v6 = vstv %s1299_s0  ;;  %v495_v8 = vadd.f32 %v494_v54, %v491_v61  ;;  %v515_v9 = vmul.f32 %v1150_v1, %v514_v4 }
  0x6c   : > { %v478_v7 = vadd.f32 %v477_v56, %v475_v60  ;;  %v519_v10 = vmul.f32 %v1156_v3, %v518_v6  ;;  %v501_v12 = vstv %s1309_s6  ;;  %v522_v13 = vstv %s1311_s11 }
  0x6d   : > { %816 = vst [vmem:[%s1227_s8 + $0xe] sm:$0x3] %v452_v63  ;;  %v457_v11 = vmul.f32 %v452_v63, %v1231_v45  ;;  %v499_v15 = vadd.f32 %v498_v62, %v495_v8  ;;  %v516_v0 = vadd.f32 %v515_v9, %v512_v2  ;;  %v523_v16 = vmul.f32 %v1159_v5, %v522_v13 }
  0x6e   : > { %v479_v14 = vmax.f32 %v478_v7, 0.0  ;;  %v526_v1 = vstv %s1325_s12  ;;  %v577_v28 = vld [vmem:[%s1227_s8 + $0x6] sm:$0xf] (%p1391_p8)  }
  0x6f   : > { %v458_v17 = vadd.f32 %v457_v11, %v433_v59  ;;  %v502_v18 = vadd.f32 %v501_v12, %v499_v15  ;;  %v520_v19 = vadd.f32 %v519_v10, %v516_v0  ;;  %578 = vst [vmem:[%s555_s15 + $0xc] sm:$0xf] (%p1391_p8), %v577_v28  }
  0x70   : > { %824 = vst [vmem:[%s1227_s8 + $0x4] sm:$0x3] %v479_v14  ;;  %v484_v3 = vmul.f32 %v479_v14, %v1189_v22  ;;  %v571_v22 = vld [vmem:[%s1227_s8] sm:$0xf] (%p1391_p8)  }
  0x71   : > { %818 = vst [vmem:[%s1279_s25 + $0x2] sm:$0x3] %v458_v17  ;;  %v503_v20 = vmax.f32 %v502_v18, 0.0  ;;  %v524_v21 = vadd.f32 %v523_v16, %v520_v19  ;;  %572 = vst [vmem:[%s555_s15] sm:$0xf] (%p1391_p8), %v571_v22  }
  0x73   : > { %830 = vst [vmem:[%s1227_s8 + $0xa] sm:$0x3] %v503_v20  ;;  %v508_v23 = vmul.f32 %v503_v20, %v1214_v37  ;;  %v527_v24 = vadd.f32 %v526_v1, %v524_v21 }
  0x74   : > { %v583_v30 = vld [vmem:[%s1227_s8 + $0xc] sm:$0xf] (%p1391_p8)  }
  0x75   : > { %v528_v25 = vmax.f32 %v527_v24, 0.0  ;;  %v509_v26 = vadd.f32 %v508_v23, %v484_v3  ;;  %551 = sbr.rel (!%p1391_p8) target bundleno = 128 (0x80), region = 52  ;;  %584 = vst [vmem:[%s555_s15 + $0x18] sm:$0xf] (%p1391_p8), %v583_v30  }
  0x77   : > { %837 = vst [vmem:[%s1227_s8 + $0x10] sm:$0x3] %v528_v25  ;;  %v533_v5 = vmul.f32 %v528_v25, %v1231_v45  ;;  %v575_v37 = vld [vmem:[%s1227_s8 + $0x4] sm:$0x3] (%p1391_p8) }
  0x78   : > { %576 = vst [vmem:[%s555_s15 + $0x4] sm:$0x3] (%p1391_p8), %v575_v37 }
  0x79   : > { %v534_v27 = vadd.f32 %v533_v5, %v509_v26 }
  0x7a   : > { %v581_v29 = vld [vmem:[%s1227_s8 + $0xa] sm:$0x3] (%p1391_p8) }
  0x7b   : > { %839 = vst [vmem:[%s1279_s25 + $0x4] sm:$0x3] %v534_v27  ;;  %582 = vst [vmem:[%s555_s15 + $0x10] sm:$0x3] (%p1391_p8), %v581_v29 }
  0x7e   : > { %v587_v45 = vld [vmem:[%s1227_s8 + $0x10] sm:$0x3] }
  0x7f   : > { %588 = vst [vmem:[%s555_s15 + $0x1c] sm:$0x3] %v587_v45 }
  0x80 PF: > { %s18_s22 = sadd.s32 1, %s1009_s22   ;;  %s1392_s18 = smov %s997_s19 }
  0x81   : > { %p15_p10 = scmp.ge.s32.totalorder %s18_s22, 4   ;;  %s1393_s19 = smov %s1093_s30 }
  0x82   : > { %s1394_s20 = smov %s1005_s21  ;;  %s1395_s21 = smov %s1397_s24 }
  0x83   :  { %17 = sbr.rel (!%p15_p10) target bundleno = 6 (0x6), region = 145 }
  0x8a   :  { %653 = vsyncpa [#allocation3], 1 }
  0x8b   :  { %655 = vsyncpa [#allocation3 + $0x1], 1 }
  0x8c   :  { %656 = vsyncpa [#allocation5], 1 }

</bundles_post_ra>
